<compile_context>
chip_gen: v7x
topology: tpu7x:2x2x1
jax: 0.10.0
libtpu: 0.0.40
codegen_flags: <defaults>
</compile_context>

<pallas_src>
import functools

import jax
import jax.numpy as jnp
from jax.experimental import pallas as pl
from jax.experimental.pallas import tpu as pltpu


def _round_up(x, m):
    return ((x + m - 1) // m) * m


def _convlstm_kernel(patches_ref, cx_ref, w_ref, b_ref, hy_ref, cy_ref, *,
                     hidden):
    """Fused (ih + hh) conv-GEMM + gate nonlinearities + LSTM state update.

    patches_ref : (1, KKCp, TN)    im2col patches (compute dtype, bf16/f32)
    cx_ref      : (1, hidden, TN)  previous cell state, f32
    w_ref       : (Gp, KKCp)       combined conv weight (compute dtype)
    b_ref       : (Gp, 1)          combined bias b_ih + b_hh, f32
    hy_ref      : (1, hidden, TN)  output hidden state
    cy_ref      : (1, hidden, TN)  output cell state
    """
    # One MXU matmul: contraction over all K*K*(Cin+hidden) patch rows;
    # spatial positions (TN, a multiple of 128) sit in the lane dimension.
    gates = jnp.dot(w_ref[...], patches_ref[0],
                    preferred_element_type=jnp.float32)        # (Gp, TN) f32
    gates = gates + b_ref[...]                                  # lane broadcast

    h = hidden
    ingate     = jax.nn.sigmoid(gates[0 * h:1 * h, :])          # (h, TN)
    forgetgate = jax.nn.sigmoid(gates[1 * h:2 * h, :])
    cellgate   = jnp.tanh(      gates[2 * h:3 * h, :])
    outgate    = jax.nn.sigmoid(gates[3 * h:4 * h, :])

    cx = cx_ref[0]                                              # (h, TN) f32
    cy = forgetgate * cx + ingate * cellgate
    hy = outgate * jnp.tanh(cy)

    cy_ref[0] = cy.astype(cy_ref.dtype)
    hy_ref[0] = hy.astype(hy_ref.dtype)


def conv_lstm_cell(x_nchw, hx_nchw, cx_nchw, w_ih, b_ih, w_hh, b_hh, *,
                   kernel_size, compute_dtype=jnp.bfloat16,
                   vmem_budget_bytes=8 * 1024 * 1024):
    """ConvLstmCell.forward.

    x_nchw : (B, Cin, H, W)          hx/cx : (B, hidden, H, W)
    w_ih   : (K, K, Cin, 4*hidden)   b_ih  : (4*hidden,)      (HWIO weights)
    w_hh   : (K, K, hidden, 4*h)     b_hh  : (4*hidden,)
    returns (hy, cy) in NCHW.
    """
    B, Cin, H, W = x_nchw.shape
    hidden = hx_nchw.shape[1]
    K = kernel_size
    if K % 2 != 1:
        raise ValueError("conv_lstm_cell requires odd kernel_size: PyTorch "
                         "padding=K//2 changes the output size for even K.")
    p = K // 2
    C = Cin + hidden
    N = H * W
    G = 4 * hidden
    Gp = _round_up(G, 16)               # sublane-friendly gate rows
    KKC = K * K * C
    KKCp = _round_up(KKC, 128)          # lane-dense weight / aligned contraction
    out_dtype = x_nchw.dtype

    # ---- parameter prep: one fused weight (Gp, KKCp) + one bias ----------
    w_cat = jnp.concatenate([w_ih, w_hh], axis=2)            # (K, K, C, 4h)
    w_t = w_cat.reshape(KKC, G).T                            # (4h, K*K*C)
    w_t = jnp.pad(w_t, ((0, Gp - G), (0, KKCp - KKC))).astype(compute_dtype)
    bias = jnp.pad((b_ih + b_hh).reshape(G, 1), ((0, Gp - G), (0, 0)))
    bias = bias.astype(jnp.float32)

    # ---- im2col patches, channel-major: (B, K*K*C, H*W) ------------------
    # (x / hx / cx stay channel-major: zero NCHW<->NHWC transposes)
    z = jnp.concatenate([x_nchw, hx_nchw], axis=1)           # (B, C, H, W)
    zp = jnp.pad(z, ((0, 0), (0, 0), (p, p), (p, p)))
    cols = [zp[:, :, ky:ky + H, kx:kx + W]
            for ky in range(K) for kx in range(K)]
    patches = jnp.concatenate(cols, axis=1).reshape(B, KKC, N)
    patches = jnp.pad(patches, ((0, 0), (0, KKCp - KKC), (0, 0)))
    patches = patches.astype(compute_dtype)
    # TODO(synk): for large H*W, build the patches inside the kernel from a
    # halo-ed row tile to avoid the K*K x HBM blow-up of wrapper-side im2col.

    cx_flat = cx_nchw.reshape(B, hidden, N).astype(jnp.float32)

    # ---- spatial tiling: multiple of 128 lanes, sized for a VMEM budget ---
    cd_bytes = jnp.dtype(compute_dtype).itemsize
    bytes_per_col = (2 * (KKCp * cd_bytes + 3 * hidden * 4)   # dbl-buffered io
                     + Gp * 4)                                # f32 gates temp
    max_tn = max(128, vmem_budget_bytes // max(bytes_per_col, 1))
    tn = N
    cand = 128
    while cand <= min(N, max_tn):
        if N % cand == 0:
            tn = cand
        cand += 128
    if N % tn != 0:                      # no multiple of 128 divides N
        tn = N
    n_tiles = N // tn

    est_tile_bytes = tn * bytes_per_col + Gp * KKCp * cd_bytes + Gp * 4
    # explicit scoped-VMEM limit; stay well under v7x's 64 MiB physical VMEM
    vmem_limit = int(min(48 * 1024 * 1024,
                         max(32 * 1024 * 1024, 4 * est_tile_bytes)))

    kernel = functools.partial(_convlstm_kernel, hidden=hidden)

    hy, cy = pl.pallas_call(
        kernel,
        out_shape=(jax.ShapeDtypeStruct((B, hidden, N), out_dtype),
                   jax.ShapeDtypeStruct((B, hidden, N), out_dtype)),
        grid=(B, n_tiles),
        in_specs=[
            pl.BlockSpec((1, KKCp, tn), lambda b, t: (b, 0, t)),    # patches
            pl.BlockSpec((1, hidden, tn), lambda b, t: (b, 0, t)),  # cx
            pl.BlockSpec((Gp, KKCp), lambda b, t: (0, 0)),          # weight
            pl.BlockSpec((Gp, 1), lambda b, t: (0, 0)),             # bias
        ],
        out_specs=(
            pl.BlockSpec((1, hidden, tn), lambda b, t: (b, 0, t)),  # hy
            pl.BlockSpec((1, hidden, tn), lambda b, t: (b, 0, t)),  # cy
        ),
        compiler_params=pltpu.CompilerParams(
            dimension_semantics=("parallel", "parallel"),
            vmem_limit_bytes=vmem_limit),
    )(patches, cx_flat, w_t, bias)

    return hy.reshape(B, hidden, H, W), cy.reshape(B, hidden, H, W)


def _reference(x, hx, cx, w_ih, b_ih, w_hh, b_hh, kernel_size):
    """Pure-JAX reference (NCHW, matches the PyTorch module semantics)."""
    pad = kernel_size // 2
    dn = jax.lax.conv_dimension_numbers(x.shape, (1, 1, 1, 1),
                                        ('NCHW', 'HWIO', 'NCHW'))
    hp = jax.lax.Precision.HIGHEST
    gates = (jax.lax.conv_general_dilated(x, w_ih, (1, 1),
                                          [(pad, pad), (pad, pad)],
                                          dimension_numbers=dn, precision=hp)
             + b_ih[None, :, None, None]
             + jax.lax.conv_general_dilated(hx, w_hh, (1, 1),
                                            [(pad, pad), (pad, pad)],
                                            dimension_numbers=dn, precision=hp)
             + b_hh[None, :, None, None])
    hidden = hx.shape[1]
    i, f, g, o = (gates[:, k * hidden:(k + 1) * hidden] for k in range(4))
    i = jax.nn.sigmoid(i); f = jax.nn.sigmoid(f)
    g = jnp.tanh(g);       o = jax.nn.sigmoid(o)
    cy = f * cx + i * g
    hy = o * jnp.tanh(cy)
    return hy, cy


if __name__ == "__main__":
    # Small shapes consistent with the module.
    B, Cin, H, W = 2, 4, 16, 16
    hidden = 8
    K = 3

    key = jax.random.PRNGKey(0)
    ks = jax.random.split(key, 7)

    # PyTorch Conv2d default init: U(-b, b), b = 1/sqrt(fan_in).
    bound_ih = 1.0 / (Cin * K * K) ** 0.5
    bound_hh = 1.0 / (hidden * K * K) ** 0.5
    w_ih = jax.random.uniform(ks[0], (K, K, Cin, 4 * hidden),
                              jnp.float32, -bound_ih, bound_ih)
    b_ih = jax.random.uniform(ks[1], (4 * hidden,),
                              jnp.float32, -bound_ih, bound_ih)
    w_hh = jax.random.uniform(ks[2], (K, K, hidden, 4 * hidden),
                              jnp.float32, -bound_hh, bound_hh)
    b_hh = jax.random.uniform(ks[3], (4 * hidden,),
                              jnp.float32, -bound_hh, bound_hh)

    x = jax.random.normal(ks[4], (B, Cin, H, W), jnp.float32)
    hx = jax.random.normal(ks[5], (B, hidden, H, W), jnp.float32)
    cx = jax.random.normal(ks[6], (B, hidden, H, W), jnp.float32)

    hy_ref, cy_ref = _reference(x, hx, cx, w_ih, b_ih, w_hh, b_hh, K)

    # f32 compute path: tight check of the fused-GEMM / gate wiring.
    hy32, cy32 = conv_lstm_cell(x, hx, cx, w_ih, b_ih, w_hh, b_hh,
                                kernel_size=K, compute_dtype=jnp.float32)
    jax.block_until_ready((hy32, cy32))
    assert jnp.allclose(hy32, hy_ref, rtol=5e-3, atol=5e-3)
    assert jnp.allclose(cy32, cy_ref, rtol=5e-3, atol=5e-3)

    # bf16 MXU path (default): bf16 operands, f32 accumulation + f32 gates.
    hy, cy = conv_lstm_cell(x, hx, cx, w_ih, b_ih, w_hh, b_hh, kernel_size=K)
    jax.block_until_ready((hy, cy))
    assert jnp.allclose(hy, hy_ref, rtol=3e-2, atol=3e-2)
    assert jnp.allclose(cy, cy_ref, rtol=3e-2, atol=3e-2)

    print("KERNEL_OK")
</pallas_src>

<mosaic_0001>
module attributes {stable_mosaic.version = 11 : i64} {
  func.func @_convlstm_kernel(%arg0: i32, %arg1: i32, %arg2: memref<1x128x256xf32, #tpu.memory_space<vmem>>, %arg3: memref<1x8x256xf32, #tpu.memory_space<vmem>>, %arg4: memref<32x128xf32, #tpu.memory_space<vmem>>, %arg5: memref<32x1xf32, #tpu.memory_space<vmem>>, %arg6: memref<1x8x256xf32, #tpu.memory_space<vmem>>, %arg7: memref<1x8x256xf32, #tpu.memory_space<vmem>>) attributes {dimension_semantics = [#tpu.dimension_semantics<parallel>, #tpu.dimension_semantics<parallel>], iteration_bounds = array<i64: 2, 1>, scalar_prefetch = 0 : i64, scratch_operands = 0 : i64, tpu.core_type = #tpu.core_type<tc>, window_params = [{transform_indices = @transform_0, window_bounds = array<i64: 1, 128, 256>}, {transform_indices = @transform_1, window_bounds = array<i64: 1, 8, 256>}, {pipeline_mode = #tpu.pipeline_mode<synchronous>, transform_indices = @transform_2, window_bounds = array<i64: 32, 128>}, {pipeline_mode = #tpu.pipeline_mode<synchronous>, transform_indices = @transform_3, window_bounds = array<i64: 32, 1>}, {transform_indices = @transform_4, window_bounds = array<i64: 1, 8, 256>}, {transform_indices = @transform_5, window_bounds = array<i64: 1, 8, 256>}]} {
    %c0 = arith.constant 0 : index
    %c0_0 = arith.constant 0 : index
    %0 = vector.load %arg4[%c0, %c0_0] : memref<32x128xf32, #tpu.memory_space<vmem>>, vector<32x128xf32>
    %c0_1 = arith.constant 0 : index
    %c0_2 = arith.constant 0 : index
    %c0_3 = arith.constant 0 : index
    %1 = vector.load %arg2[%c0_1, %c0_2, %c0_3] : memref<1x128x256xf32, #tpu.memory_space<vmem>>, vector<1x128x256xf32>
    %2 = vector.shape_cast %1 : vector<1x128x256xf32> to vector<128x256xf32>
    %cst = arith.constant dense<0.000000e+00> : vector<32x256xf32>
    %3 = tpu.matmul %0, %2, %cst {dimension_numbers = #tpu.dot_dimension_numbers<[1], [0], [0], [1], [0, 0, 1, 1], [], []>} : vector<32x128xf32>, vector<128x256xf32>, vector<32x256xf32> -> vector<32x256xf32>
    %c0_4 = arith.constant 0 : index
    %c0_5 = arith.constant 0 : index
    %4 = vector.load %arg5[%c0_4, %c0_5] : memref<32x1xf32, #tpu.memory_space<vmem>>, vector<32x1xf32>
    %5 = vector.broadcast %4 : vector<32x1xf32> to vector<32x256xf32>
    %6 = arith.addf %3, %5 : vector<32x256xf32>
    %7 = vector.extract_strided_slice %6 {offsets = [0, 0], sizes = [8, 256], strides = [1, 1]} : vector<32x256xf32> to vector<8x256xf32>
    %8 = arith.negf %7 : vector<8x256xf32>
    %9 = math.exp %8 : vector<8x256xf32>
    %cst_6 = arith.constant 1.000000e+00 : f32
    %10 = vector.broadcast %cst_6 : f32 to vector<8x256xf32>
    %11 = arith.addf %10, %9 : vector<8x256xf32>
    %12 = arith.divf %10, %11 : vector<8x256xf32>
    %13 = vector.extract_strided_slice %6 {offsets = [8, 0], sizes = [8, 256], strides = [1, 1]} : vector<32x256xf32> to vector<8x256xf32>
    %14 = arith.negf %13 : vector<8x256xf32>
    %15 = math.exp %14 : vector<8x256xf32>
    %cst_7 = arith.constant 1.000000e+00 : f32
    %16 = vector.broadcast %cst_7 : f32 to vector<8x256xf32>
    %17 = arith.addf %16, %15 : vector<8x256xf32>
    %18 = arith.divf %16, %17 : vector<8x256xf32>
    %19 = vector.extract_strided_slice %6 {offsets = [16, 0], sizes = [8, 256], strides = [1, 1]} : vector<32x256xf32> to vector<8x256xf32>
    %20 = math.tanh %19 : vector<8x256xf32>
    %21 = vector.extract_strided_slice %6 {offsets = [24, 0], sizes = [8, 256], strides = [1, 1]} : vector<32x256xf32> to vector<8x256xf32>
    %22 = arith.negf %21 : vector<8x256xf32>
    %23 = math.exp %22 : vector<8x256xf32>
    %cst_8 = arith.constant 1.000000e+00 : f32
    %24 = vector.broadcast %cst_8 : f32 to vector<8x256xf32>
    %25 = arith.addf %24, %23 : vector<8x256xf32>
    %26 = arith.divf %24, %25 : vector<8x256xf32>
    %c0_9 = arith.constant 0 : index
    %c0_10 = arith.constant 0 : index
    %c0_11 = arith.constant 0 : index
    %27 = vector.load %arg3[%c0_9, %c0_10, %c0_11] : memref<1x8x256xf32, #tpu.memory_space<vmem>>, vector<1x8x256xf32>
    %28 = vector.shape_cast %27 : vector<1x8x256xf32> to vector<8x256xf32>
    %29 = arith.mulf %18, %28 : vector<8x256xf32>
    %30 = arith.mulf %12, %20 : vector<8x256xf32>
    %31 = arith.addf %29, %30 : vector<8x256xf32>
    %32 = math.tanh %31 : vector<8x256xf32>
    %33 = arith.mulf %26, %32 : vector<8x256xf32>
    %c0_12 = arith.constant 0 : index
    %c0_13 = arith.constant 0 : index
    %c0_14 = arith.constant 0 : index
    %34 = vector.load %arg7[%c0_12, %c0_13, %c0_14] : memref<1x8x256xf32, #tpu.memory_space<vmem>>, vector<1x8x256xf32>
    %35 = vector.shape_cast %34 : vector<1x8x256xf32> to vector<8x256xf32>
    %36 = vector.shape_cast %31 : vector<8x256xf32> to vector<1x8x256xf32>
    tpu.vector_store %arg7[%c0_12, %c0_13, %c0_14], %36 {strides = array<i32>} : memref<1x8x256xf32, #tpu.memory_space<vmem>>, vector<1x8x256xf32>,
    %c0_15 = arith.constant 0 : index
    %c0_16 = arith.constant 0 : index
    %c0_17 = arith.constant 0 : index
    %37 = vector.load %arg6[%c0_15, %c0_16, %c0_17] : memref<1x8x256xf32, #tpu.memory_space<vmem>>, vector<1x8x256xf32>
    %38 = vector.shape_cast %37 : vector<1x8x256xf32> to vector<8x256xf32>
    %39 = vector.shape_cast %33 : vector<8x256xf32> to vector<1x8x256xf32>
    tpu.vector_store %arg6[%c0_15, %c0_16, %c0_17], %39 {strides = array<i32>} : memref<1x8x256xf32, #tpu.memory_space<vmem>>, vector<1x8x256xf32>,
    return
  }
  func.func @transform_0(%arg0: i32, %arg1: i32) -> (i32, i32, i32) {
    %c0_i32 = arith.constant 0 : i32
    %c0_i32_0 = arith.constant 0 : i32
    return %arg0, %c0_i32, %arg1 : i32, i32, i32
  }
  func.func @transform_1(%arg0: i32, %arg1: i32) -> (i32, i32, i32) {
    %c0_i32 = arith.constant 0 : i32
    %c0_i32_0 = arith.constant 0 : i32
    return %arg0, %c0_i32, %arg1 : i32, i32, i32
  }
  func.func @transform_2(%arg0: i32, %arg1: i32) -> (i32, i32) {
    %c0_i32 = arith.constant 0 : i32
    %c0_i32_0 = arith.constant 0 : i32
    %c0_i32_1 = arith.constant 0 : i32
    return %c0_i32, %c0_i32_0 : i32, i32
  }
  func.func @transform_3(%arg0: i32, %arg1: i32) -> (i32, i32) {
    %c0_i32 = arith.constant 0 : i32
    %c0_i32_0 = arith.constant 0 : i32
    %c0_i32_1 = arith.constant 0 : i32
    return %c0_i32, %c0_i32_0 : i32, i32
  }
  func.func @transform_4(%arg0: i32, %arg1: i32) -> (i32, i32, i32) {
    %c0_i32 = arith.constant 0 : i32
    %c0_i32_0 = arith.constant 0 : i32
    return %arg0, %c0_i32, %arg1 : i32, i32, i32
  }
  func.func @transform_5(%arg0: i32, %arg1: i32) -> (i32, i32, i32) {
    %c0_i32 = arith.constant 0 : i32
    %c0_i32_0 = arith.constant 0 : i32
    return %arg0, %c0_i32, %arg1 : i32, i32, i32
  }
}

</mosaic_0001>

<bundles_post_ra>
// kernel: tpu_custom_call.1
= control target key start
LH: loop header
LB: loop body
LE: loop exit
PB: predicated region body
PF: predicated region fallthrough
CT: control target
= control target key end

     0   :  { %11 = vsyncpa [#allocation3], 0  ;;  %s1443_s0 = inlined_call_operand.hbm [shape: f32[2,128,256], index: 0, kind: input, shape index: {}]   ;;  %s1444_s1 = inlined_call_operand.vmem [shape: f32[2,8,256], index: 1, kind: input, shape index: {}]   ;;  %s1445_s2 = inlined_call_operand.hbm [shape: f32[32,128], index: 2, kind: input, shape index: {}]   ;;  %s1446_s3 = inlined_call_operand.vmem [shape: f32[32,1], index: 3, kind: input, shape index: {}]   ;;  %s1447_s4 = inlined_call_operand.hbm [shape: f32[2,8,256], index: 4, kind: output, shape index: {0}]   ;;  %s1448_s5 = inlined_call_operand.hbm [shape: f32[2,8,256], index: 5, kind: output, shape index: {1}]  }
   0x1   :  { %13 = vsyncpa [#allocation3 + $0x1], 0 }
   0x2   :  { %14 = vsyncpa [#allocation6], 0 }
   0x3   :  { %15 = vsyncpa [#allocation4], 0 }
   0x4   :  { %17 = vsyncpa [#allocation4 + $0x1], 0 }
   0x5   :  { %18 = vsyncpa [#allocation9], 0 }
   0x6   :  { %20 = vsyncpa [#allocation9 + $0x1], 0  ;;  %s1133_s18 = smov 0   ;;  %s1135_s19 = smov 0  }
   0x7   :  { %s1137_s20 = smov 0   ;;  %s1139_s21 = smov 0  }
   0x8   :  { %s1141_s22 = smov 0   ;;  %s1143_s23 = smov 0  }
   0x9 LB: > { %s716_s24 = sadd.s32 4294967295, %s1091_s23   ;;  %s717_s25 = sadd.s32 4294967294, %s1091_s23   ;;  %s1091_s23 = sphi %s1143_s23, %s26_s23   ;;  %s1087_s22 = sphi %s1141_s22, %s1472_s22   ;;  %s1083_s21 = sphi %s1139_s21, %s1471_s21   ;;  %s1079_s20 = sphi %s1137_s20, %s1470_s20   ;;  %s1075_s19 = sphi %s1135_s19, %s1469_s19   ;;  %s1071_s18 = sphi %s1133_s18, %s1468_s18  }
   0xa   : > { %p60_p0 = scmp.ne.s32.totalorder %s1075_s19, %s1071_s18  ;;  %p1167_p1 = scmp.eq.s32.totalorder %s716_s24, 0 }
   0xb   : > { %p1171_p2 = scmp.eq.s32.totalorder %s716_s24, 1  ;;  %p162_p3 = scmp.eq.s32.totalorder %s717_s25, 1 }
   0xc   : > { %s1453_s26 = scalar_select %p1167_p1, 1, 0 }
   0xd   : > { %s1454_s27 = scalar_select %p1171_p2, 1, 0 }
   0xe   : > { %p1177_p4 = por %p1167_p1, %p60_p0  ;;  %p718_p5 = scmp.ge.s32.totalorder %s1091_s23, 1 }
   0xf   : > { %p1182_p6 = por %p162_p3, %p60_p0  ;;  %p197_p7 = scmp.lt.s32.totalorder %s1091_s23, 3 }
  0x10   : > { %s1455_s28 = scalar_select %p1177_p4, 1, 0 }
  0x11   : > { %s1456_s29 = scalar_select %p1182_p6, 1, 0 }
  0x12   : > { %p1187_p8 = pnand %p718_p5, %p197_p7  ;;  %s1093_s6 = smov [#allocation5]  }
  0x13   : > { %s209_s7 = sshll.u32 %s1093_s6, 4  ;;  %s38_s9 = sadd.s32 1, %s1087_s22  ;;  %s210_s7 = int_to_ptr.vmem [resolvable:$true] %s209_s7 }
  0x14   : > { %s1457_s30 = scalar_select %p1187_p8, 1, 0 }
  0x15   : > { %p807_p9 = pneg %p1187_p8  ;;  %s915_s12 = scalar_lea.hbm %s1445_s2, 512 }
  0x16   : > { %p916_p12 = scmp.ne.s32.totalorder %s1445_s2, %s915_s12  ;;  %p922_p5 = scmp.lt.u32.totalorder %s915_s12, %s1445_s2 }
  0x17   : > { %p1196_p11 = pnand %p807_p9, %p1167_p1 }
  0x19   : > { %p917_p13 = pneg %p1196_p11 }
  0x1b   : > { %p918_p0 = pnand %p917_p13, %p916_p12 }
  0x1d   : > { %p919_p3 = pneg %p918_p0 }
  0x1f   : > { %p924_p7 = pnand %p922_p5, %p919_p3 }
  0x21   : > { %927 = shalt.err (!%p924_p7)
}
  0x22   : > { %s928_s17 = scalar_lea.vmem %s210_s7, 512  ;;  %p936_p1 = scmp.lt.s32.totalorder %s210_s7, %s210_s7 }
  0x23   : > { %p929_p9 = scmp.ne.s32.totalorder %s210_s7, %s928_s17  ;;  %p937_p4 = scmp.lt.s32.totalorder %s928_s17, %s928_s17 }
  0x25   : > { %p931_p10 = pnand %p929_p9, %p917_p13  ;;  %p938_p8 = por %p937_p4, %p936_p1 }
  0x27   : > { %p932_p6 = pneg %p931_p10 }
  0x29   : > { %p939_p2 = pnand %p938_p8, %p932_p6 }
  0x2b   : > { %942 = shalt.err (!%p939_p2)
}
  0x2c   : > { %s1094_s24 = smov 128   ;;  %s1095_s25 = smov 8  }
  0x2d   : > { %810 = dma.hbm_to_vmem [thread:$0]  (!%p1196_p11), %s1445_s2, 512, %s210_s7, [#allocation6], %s1094_s24, %s1094_s24, %s1095_s25  }
  0x2e   : > { %p40_p1 = scmp.ge.s32.totalorder %s38_s9, 2  ;;  %s47_s11 = sadd.s32 1, %s1079_s20 }
  0x2f   : > { %p54_p2 = scmp.ne.s32.totalorder %s1079_s20, %s1075_s19  ;;  %p55_p4 = scmp.eq.s32.totalorder %s1091_s23, 0 }
  0x30   : > { %s1474_s9 = smov (%p40_p1, %s38_s9), 0  ;;  %p1460_p8 = scmp.ne.s32.totalorder %s1454_s27, 0 }
  0x31   : > { %p1223_p6 = por %p55_p4, %p54_p2  ;;  %s42_s8 = ssub.s32 %s1087_s22, %s1474_s9 }
  0x32   : > { %p1229_p10 = por %p1460_p8, %p54_p2  ;;  %p823_p12 = scmp.lt.s32.totalorder %s1091_s23, 2 }
  0x33   : > { %p45_p11 = scmp.eq.s32.totalorder %s42_s8, 0  ;;  %s226_s7 = sand.u32 1, %s1079_s20  }
  0x34   : > { %s721_s14 = sshll.u32 %s226_s7, 8  ;;  %s745_s16 = sshll.u32 %s1087_s22, 12 }
  0x35   : > { %s1238_s15 = scalar_select %p45_p11, %s1079_s20, %s47_s11  }
  0x36   : > { %s1244_s25 = scalar_lea.hbm %s1443_s0, %s745_s16  ;;  %s230_s27 = scalar_lea.vmem [#allocation2], %s721_s14 }
  0x37   : > { %s239_s6 = sshll.u32 %s230_s27, 4  ;;  %p1250_p13 = pnand %p823_p12, %p1223_p6  ;;  %s1246_s6 = int_to_ptr.vmem [resolvable:$true] %s239_s6 }
  0x38   : > { %s1254_s11 = scalar_lea.sflag [#allocation3], %s226_s7  ;;  %s943_s8 = scalar_lea.hbm %s1244_s25, 4096 }
  0x39   : > { %p944_p0 = scmp.ne.s32.totalorder %s1244_s25, %s943_s8  ;;  %p945_p3 = pneg %p1250_p13 }
  0x3a   : > { %s948_s12 = scalar_lea.hbm %s1443_s0, 8192  ;;  %p949_p9 = scmp.lt.u32.totalorder %s1244_s25, %s1443_s0 }
  0x3b   : > { %p946_p5 = pnand %p945_p3, %p944_p0  ;;  %p950_p1 = scmp.lt.u32.totalorder %s948_s12, %s943_s8 }
  0x3c   : > { %p952_p4 = scmp.lt.u32.totalorder %s943_s8, %s1244_s25 }
  0x3d   : > { %p947_p7 = pneg %p946_p5  ;;  %p951_p2 = por %p950_p1, %p949_p9 }
  0x3f   : > { %p953_p6 = por %p952_p4, %p951_p2 }
  0x41   : > { %p954_p8 = pnand %p953_p6, %p947_p7 }
  0x43   : > { %957 = shalt.err (!%p954_p8)
}
  0x44   : > { %s958_s7 = scalar_lea.vmem %s1246_s6, 4096  ;;  %s1096_s27 = smov [#allocation2]  }
  0x45   : > { %p959_p12 = scmp.ne.s32.totalorder %s1246_s6, %s958_s7  ;;  %s963_s14 = sshll.u32 %s1096_s27, 4  ;;  %s964_s14 = int_to_ptr.vmem [resolvable:$false] %s963_s14 }
  0x46   : > { %s965_s16 = scalar_lea.vmem %s964_s14, 8192  ;;  %p966_p5 = scmp.lt.s32.totalorder %s1246_s6, %s964_s14 }
  0x47   : > { %p961_p11 = pnand %p959_p12, %p945_p3  ;;  %p967_p9 = scmp.lt.s32.totalorder %s965_s16, %s958_s7 }
  0x49   : > { %p962_p0 = pneg %p961_p11  ;;  %p968_p1 = por %p967_p9, %p966_p5 }
  0x4b   : > { %p969_p2 = pnand %p968_p1, %p962_p0 }
  0x4d   : > { %972 = shalt.err (!%p969_p2)
}
  0x4e   : > { %s1097_s8 = smov 256   ;;  %s1098_s12 = smov 16  }
  0x4f   : > { %814 = dma.hbm_to_vmem [thread:$0]  (!%p1250_p13), %s1244_s25, 4096, %s1246_s6, %s1254_s11, %s1097_s8, %s1097_s8, %s1098_s12  }
  0x50   : > { %p1463_p3 = scmp.ne.s32.totalorder %s1457_s30, 0 }
  0x51   : > { %s1285_s17 = sand.u32 (!%p1463_p3), 1, %s1075_s19   ;;  %p1464_p7 = scmp.ne.s32.totalorder (!%p1463_p3), %s1455_s28, 0 }
  0x52   : > { %264 = sbr.rel (%p1463_p3) target bundleno = 415 (0x19f), region = 36  ;;  %s725_s24 = sshll.u32 (!%p1463_p3), %s1285_s17, 8 }
  0x53   : > { %s267_s7 = scalar_lea.sflag (!%p1463_p3), [#allocation3], %s1285_s17  ;;  %s1289_s27 = scalar_lea.vmem (!%p1463_p3), [#allocation2], %s725_s24 }
  0x59   : > { %1054 = dma.done.wait (%p1464_p7), %s267_s7, 4096  }
  0x5a   : > { %1056 = vsyncadd (%p1464_p7), %s267_s7, 4294963200  ;;  %p1465_p13 = scmp.ne.s32.totalorder %s1453_s26, 0 }
  0x5c   : > { %1058 = dma.done.wait (%p1465_p13), [#allocation6], 512  }
  0x5d   : > { %1060 = vsyncadd (%p1465_p13), [#allocation6], 4294966784  ;;  %v1099_v0 = vmov 0.0   ;;  %v1100_v1 = vmov 0   ;;  %v333_v2 = vld [vmem:[%s1289_s27 + $0x8] sm:$0xff]  ;;  %v335_v3 = vld [vmem:[%s1289_s27 + $0x18] sm:$0xff] }
  0x5e   : > { %452 = vmatprep.mubr.f32.mxu0 %v1099_v0  ;;  %464 = vmatprep.mubr.f32.mxu1 %v1099_v0  ;;  %v332_v4 = vld [vmem:[%s1289_s27] sm:$0xff]  ;;  %v749_v5 = vpack.c.bf16 %v335_v3, %v333_v2  ;;  %v334_v6 = vld [vmem:[%s1289_s27 + $0x10] sm:$0xff]  ;;  %v337_v7 = vld [vmem:[%s1289_s27 + $0x28] sm:$0xff]  ;;  %p317_p4 = scmp.lt.s32.totalorder %s1083_s21, 1  ;;  %s747_s26 = sshll.u32 %s1083_s21, 8 }
  0x5f   : > { %881 = vset.pattern.permute.xlu0 %v1100_v1  ;;  %882 = vset.pattern.permute.xlu1 %v1100_v1  ;;  %v339_v8 = vld [vmem:[%s1289_s27 + $0x38] sm:$0xff]  ;;  %v751_v9 = vpack.c.bf16 %v334_v6, %v332_v4  ;;  %v336_v11 = vld [vmem:[%s1289_s27 + $0x20] sm:$0xff]  ;;  %v338_v12 = vld [vmem:[%s1289_s27 + $0x30] sm:$0xff]  ;;  %s1361_s10 = scalar_lea.hbm %s1448_s5, %s747_s26  ;;  %s537_s11 = scalar_lea.sflag [#allocation9], %s1285_s17 }
  0x60   : > { %v753_v10 = vpack.c.bf16 %v339_v8, %v337_v7  ;;  %v341_v13 = vld [vmem:[%s1289_s27 + $0x48] sm:$0xff]  ;;  %750 = vmatprep.subr.bf16.mxu0 %v749_v5  ;;  %v343_v14 = vld [vmem:[%s1289_s27 + $0x58] sm:$0xff]  ;;  %781 = vmatprep.subr.bf16.mxu1 %v749_v5  ;;  %v755_v15 = vpack.c.bf16 %v338_v12, %v336_v11  ;;  %v340_v17 = vld [vmem:[%s1289_s27 + $0x40] sm:$0xff]  ;;  %s318_s16 = scalar_select %p317_p4, %s1083_s21, 1 }
  0x61   : > { %752 = vmatpush1.bf16.msra.mxu0 %v751_v9  ;;  %789 = vmatpush1.bf16.msra.mxu1 %v751_v9  ;;  %v757_v16 = vpack.c.bf16 %v343_v14, %v341_v13  ;;  %v342_v18 = vld [vmem:[%s1289_s27 + $0x50] sm:$0xff]  ;;  %v345_v19 = vld [vmem:[%s1289_s27 + $0x68] sm:$0xff]  ;;  %v347_v20 = vld [vmem:[%s1289_s27 + $0x78] sm:$0xff] }
  0x62   : > { %754 = vmatprep.subr.bf16.mxu0 %v753_v10  ;;  %782 = vmatprep.subr.bf16.mxu1 %v753_v10  ;;  %v759_v21 = vpack.c.bf16 %v342_v18, %v340_v17  ;;  %v761_v22 = vpack.c.bf16 %v347_v20, %v345_v19  ;;  %v344_v23 = vld [vmem:[%s1289_s27 + $0x60] sm:$0xff]  ;;  %v346_v24 = vld [vmem:[%s1289_s27 + $0x70] sm:$0xff]  ;;  %v349_v25 = vld [vmem:[%s1289_s27 + $0x88] sm:$0xff]  ;;  %s746_s8 = sshll.u32 %s318_s16, 4  ;;  %s1101_s16 = smov [#allocation8]  }
  0x63   : > { %v351_v26 = vld [vmem:[%s1289_s27 + $0x98] sm:$0xff]  ;;  %v763_v27 = vpack.c.bf16 %v346_v24, %v344_v23  ;;  %v364_v28 = vld [vmem:[%s1446_s3] sm:$0xff]  ;;  %v366_v29 = vld [vmem:[%s1446_s3 + $0x10] sm:$0xff]  ;;  %s324_s7 = scalar_lea.vmem %s1444_s1, %s746_s8  ;;  %s977_s8 = sshll.u32 %s1101_s16, 4  ;;  %s978_s8 = int_to_ptr.vmem [resolvable:$false] %s977_s8 }
  0x64   : > { %v765_v30 = vpack.c.bf16 %v351_v26, %v349_v25  ;;  %v348_v31 = vld [vmem:[%s1289_s27 + $0x80] sm:$0xff]  ;;  %v350_v32 = vld [vmem:[%s1289_s27 + $0x90] sm:$0xff]  ;;  %v353_v33 = vld [vmem:[%s1289_s27 + $0xa8] sm:$0xff]  ;;  %370 = vperm.xlu0 %881, %v364_v28   ;;  %380 = vperm.xlu1 %882, %v366_v29   ;;  %s979_s12 = scalar_lea.vmem %s978_s8, 512 }
  0x65   : > { %756 = vmatpush1.bf16.msra.mxu0 %v755_v15  ;;  %790 = vmatpush1.bf16.msra.mxu1 %v755_v15  ;;  %v355_v34 = vld [vmem:[%s1289_s27 + $0xb8] sm:$0xff]  ;;  %v365_v35 = vld [vmem:[%s1446_s3 + $0x8] sm:$0xff]  ;;  %v767_v37 = vpack.c.bf16 %v350_v32, %v348_v31  ;;  %v352_v39 = vld [vmem:[%s1289_s27 + $0xa0] sm:$0xff] }
  0x66   : > { %758 = vmatprep.subr.bf16.mxu0 %v757_v16  ;;  %783 = vmatprep.subr.bf16.mxu1 %v757_v16  ;;  %v367_v36 = vld [vmem:[%s1446_s3 + $0x18] sm:$0xff]  ;;  %v769_v38 = vpack.c.bf16 %v355_v34, %v353_v33  ;;  %v354_v40 = vld [vmem:[%s1289_s27 + $0xb0] sm:$0xff]  ;;  %v357_v41 = vld [vmem:[%s1289_s27 + $0xc8] sm:$0xff] }
  0x67   : > { %v359_v42 = vld [vmem:[%s1289_s27 + $0xd8] sm:$0xff]  ;;  %v771_v43 = vpack.c.bf16 %v354_v40, %v352_v39  ;;  %v356_v45 = vld [vmem:[%s1289_s27 + $0xc0] sm:$0xff]  ;;  %v358_v46 = vld [vmem:[%s1289_s27 + $0xd0] sm:$0xff] }
  0x68   : > { %375 = vperm.xlu0 %881, %v365_v35   ;;  %385 = vperm.xlu1 %882, %v367_v36   ;;  %v773_v44 = vpack.c.bf16 %v359_v42, %v357_v41  ;;  %v361_v47 = vld [vmem:[%s1289_s27 + $0xe8] sm:$0xff]  ;;  %v363_v48 = vld [vmem:[%s1289_s27 + $0xf8] sm:$0xff]  ;;  %v775_v49 = vpack.c.bf16 %v358_v46, %v356_v45  ;;  %v360_v51 = vld [vmem:[%s1289_s27 + $0xe0] sm:$0xff] }
  0x69   : > { %760 = vmatpush1.bf16.msra.mxu0 %v759_v21  ;;  %791 = vmatpush1.bf16.msra.mxu1 %v759_v21  ;;  %v777_v50 = vpack.c.bf16 %v363_v48, %v361_v47  ;;  %v362_v52 = vld [vmem:[%s1289_s27 + $0xf0] sm:$0xff]  ;;  %v328_v54 = vld [vmem:[#allocation5] sm:$0xff]  ;;  %v329_v56 = vld [vmem:[#allocation5 + $0x8] sm:$0xff]  ;;  %s727_s27 = sshll.u32 %s1285_s17, 4 }
  0x6a   : > { %762 = vmatprep.subr.bf16.mxu0 %v761_v22  ;;  %784 = vmatprep.subr.bf16.mxu1 %v761_v22  ;;  %v779_v53 = vpack.c.bf16 %v362_v52, %v360_v51  ;;  %v330_v55 = vld [vmem:[#allocation5 + $0x10] sm:$0xff]  ;;  %v331_v57 = vld [vmem:[#allocation5 + $0x18] sm:$0xff]  ;;  %v515_v35 = vld [vmem:[%s324_s7] sm:$0xff]  ;;  %s314_s28 = scalar_lea.vmem [#allocation8], %s727_s27 }
  0x6b   : > { %s569_s30 = sshll.u32 %s314_s28, 4  ;;  %s1363_s30 = int_to_ptr.vmem [resolvable:$true] %s569_s30 }
  0x6c   : > { %s973_s14 = scalar_lea.vmem %s1363_s30, 256  ;;  %p980_p11 = scmp.lt.s32.totalorder %s1363_s30, %s978_s8 }
  0x6d   : > { %764 = vmatpush1.bf16.msra.mxu0 %v763_v27  ;;  %792 = vmatpush1.bf16.msra.mxu1 %v763_v27  ;;  %p974_p6 = scmp.ne.s32.totalorder %s1363_s30, %s973_s14  ;;  %p981_p0 = scmp.lt.s32.totalorder %s979_s12, %s973_s14 }
  0x6e   : > { %766 = vmatprep.subr.bf16.mxu0 %v765_v30  ;;  %785 = vmatprep.subr.bf16.mxu1 %v765_v30 }
  0x6f   : > { %p975_p8 = pnand %p974_p6, %p1229_p10  ;;  %p982_p5 = por %p981_p0, %p980_p11 }
  0x71   : > { %768 = vmatpush1.bf16.msra.mxu0 %v767_v37  ;;  %793 = vmatpush1.bf16.msra.mxu1 %v767_v37  ;;  %v516_v37 = vld [vmem:[%s324_s7 + $0x8] sm:$0xff]  ;;  %p976_p12 = pneg %p975_p8 }
  0x72   : > { %770 = vmatprep.subr.bf16.mxu0 %v769_v38  ;;  %786 = vmatprep.subr.bf16.mxu1 %v769_v38 }
  0x73   : > { %p983_p9 = pnand %p982_p5, %p976_p12 }
  0x75   : > { %772 = vmatpush1.bf16.msra.mxu0 %v771_v43  ;;  %794 = vmatpush1.bf16.msra.mxu1 %v771_v43 }
  0x76   : > { %774 = vmatprep.subr.bf16.mxu0 %v773_v44  ;;  %787 = vmatprep.subr.bf16.mxu1 %v773_v44 }
  0x79   : > { %776 = vmatpush1.bf16.msra.mxu0 %v775_v49  ;;  %795 = vmatpush1.bf16.msra.mxu1 %v775_v49 }
  0x7a   : > { %778 = vmatprep.subr.bf16.mxu0 %v777_v50  ;;  %788 = vmatprep.subr.bf16.mxu1 %v777_v50 }
  0x7d   : > { %780 = vmatpush1.bf16.msra.mxu0 %v779_v53  ;;  %796 = vmatpush1.bf16.msra.mxu1 %v779_v53 }
  0x80   : > { %453 = vmatmul.mubr.f32.vlgmr.msra.gmra.mrb[0].mxu0 %v328_v54  ;;  %465 = vmatmul.mubr.f32.vlgmr.msra.gmra.mrb[0].mxu1 %v330_v55 }
  0x81   : > { %458 = vmatprep.mubr.f32.mxu0 %v1099_v0  ;;  %470 = vmatprep.mubr.f32.mxu1 %v1099_v0 }
  0x84   : > { %459 = vmatmul.mubr.f32.gmra.mrb[2].mxu0 %v329_v56  ;;  %471 = vmatmul.mubr.f32.gmra.mrb[2].mxu1 %v331_v57 }
  0xe3   : > { %v371_v58 = vpop.permute.xlu0 %370  ;;  %v381_v59 = vpop.permute.xlu1 %380 }
  0xe7   : > { %v376_v4 = vpop.permute.xlu0 %375  ;;  %v386_v5 = vpop.permute.xlu1 %385 }
 0x153   : > { %v454_v60 = vpop.f32.mrb[0].mxu0  ;;  %v466_v61 = vpop.f32.mrb[0].mxu1 }
 0x154   : > { %v455_v62 = vadd.f32 %v454_v60, %v371_v58  ;;  %v456_v63 = vpop.f32.mrb[1].mxu0  ;;  %v468_v1 = vpop.f32.mrb[1].mxu1  ;;  %v467_v16 = vadd.f32 %v466_v61, %v381_v59 }
 0x155   : > { %v457_v2 = vadd.f32 %v456_v63, %v371_v58  ;;  %v469_v17 = vadd.f32 %v468_v1, %v381_v59 }
 0x156   : > { %v731_v3 = vmul.f32 -1.442695, %v455_v62 }
 0x157   : > { %v732_v6 = vmul.f32 -1.442695, %v457_v2  ;;  %v460_v7 = vpop.f32.mrb[2].mxu0  ;;  %v472_v8 = vpop.f32.mrb[2].mxu1 }
 0x158   : > { %883 = vpow2.f32 %v731_v3  ;;  %v461_v9 = vadd.f32 %v460_v7, %v376_v4  ;;  %v462_v0 = vpop.f32.mrb[3].mxu0  ;;  %v474_v10 = vpop.f32.mrb[3].mxu1  ;;  %v473_v14 = vadd.f32 %v472_v8, %v386_v5 }
 0x159   : > { %885 = vpow2.f32 %v732_v6  ;;  %v463_v11 = vadd.f32 %v462_v0, %v376_v4  ;;  %v475_v15 = vadd.f32 %v474_v10, %v386_v5 }
 0x15a   : > { %v733_v12 = vmul.f32 -1.442695, %v461_v9  ;;  %v735_v18 = vmul.f32 -1.442695, %v473_v14 }
 0x15b   : > { %v734_v13 = vmul.f32 -1.442695, %v463_v11  ;;  %v736_v19 = vmul.f32 -1.442695, %v475_v15 }
 0x15c   : > { %887 = vpow2.f32 %v733_v12 }
 0x15d   : > { %889 = vpow2.f32 %v734_v13 }
 0x15e   : > { %891 = vtanh.f32 %v467_v16 }
 0x15f   : > { %893 = vtanh.f32 %v469_v17 }
 0x160   : > { %895 = vpow2.f32 %v735_v18 }
 0x161   : > { %897 = vpow2.f32 %v736_v19 }
 0x162   : > { %v884_v20 = vpop.eup %883 }
 0x163   : > { %v886_v21 = vpop.eup %885  ;;  %v483_v22 = vadd.f32 1.0, %v884_v20 }
 0x164   : > { %v484_v23 = vadd.f32 1.0, %v886_v21 }
 0x165   : > { %899 = vrcp.f32 %v483_v22 }
 0x166   : > { %v888_v24 = vpop.eup %887  ;;  %901 = vrcp.f32 %v484_v23 }
 0x167   : > { %v890_v25 = vpop.eup %889  ;;  %v495_v26 = vadd.f32 1.0, %v888_v24 }
 0x168   : > { %v496_v27 = vadd.f32 1.0, %v890_v25  ;;  %v892_v28 = vpop.eup %891 }
 0x169   : > { %903 = vrcp.f32 %v495_v26  ;;  %v894_v29 = vpop.eup %893 }
 0x16a   : > { %905 = vrcp.f32 %v496_v27  ;;  %v896_v30 = vpop.eup %895 }
 0x16b   : > { %v898_v31 = vpop.eup %897  ;;  %v509_v38 = vadd.f32 1.0, %v896_v30 }
 0x16c   : > { %v510_v40 = vadd.f32 1.0, %v898_v31 }
 0x16d   : > { %907 = vrcp.f32 %v509_v38 }
 0x16e   : > { %909 = vrcp.f32 %v510_v40 }
 0x16f   : > { %v900_v32 = vpop.eup %899 }
 0x170   : > { %v902_v33 = vpop.eup %901  ;;  %v519_v34 = vmul.f32 %v900_v32, %v892_v28 }
 0x171   : > { %v520_v36 = vmul.f32 %v902_v33, %v894_v29 }
 0x173   : > { %v904_v39 = vpop.eup %903 }
 0x174   : > { %v906_v41 = vpop.eup %905  ;;  %v517_v42 = vmul.f32 %v904_v39, %v515_v35 }
 0x175   : > { %v518_v43 = vmul.f32 %v906_v41, %v516_v37 }
 0x176   : > { %v521_v44 = vadd.f32 %v519_v34, %v517_v42 }
 0x177   : > { %v522_v45 = vadd.f32 %v520_v36, %v518_v43 }
 0x178   : > { %911 = vtanh.f32 %v521_v44  ;;  %527 = vst [vmem:[%s314_s28] sm:$0xff] %v521_v44 }
 0x179   : > { %913 = vtanh.f32 %v522_v45  ;;  %528 = vst [vmem:[%s314_s28 + $0x8] sm:$0xff] %v522_v45 }
 0x17a   : > { %986 = shalt.err (!%p983_p9)
}
 0x17b   : > { %s987_s24 = scalar_lea.hbm %s1361_s10, 256  ;;  %s991_s25 = scalar_lea.hbm %s1448_s5, 512 }
 0x17c   : > { %p988_p1 = scmp.ne.s32.totalorder %s1361_s10, %s987_s24  ;;  %p992_p7 = scmp.lt.u32.totalorder %s1361_s10, %s1448_s5 }
 0x17d   : > { %p993_p13 = scmp.lt.u32.totalorder %s991_s25, %s987_s24  ;;  %p995_p6 = scmp.lt.u32.totalorder %s987_s24, %s1361_s10 }
 0x17e   : > { %p989_p2 = pnand %p988_p1, %p1229_p10 }
 0x17f   : > { %p994_p4 = por %p993_p13, %p992_p7 }
 0x180   : > { %p990_p3 = pneg %p989_p2 }
 0x181   : > { %p996_p8 = por %p995_p6, %p994_p4 }
 0x183   : > { %p997_p12 = pnand %p996_p8, %p990_p3 }
 0x185   : > { %1000 = shalt.err (!%p997_p12)
}
 0x186   : > { %804 = dma.vmem_to_hbm [thread:$0]  (%p1229_p10), %s1363_s30, 256, %s1361_s10, %s537_s11   ;;  %v908_v46 = vpop.eup %907 }
 0x187   : > { %v910_v47 = vpop.eup %909  ;;  %s307_s14 = scalar_lea.vmem [#allocation7], %s727_s27  ;;  %s1394_s7 = scalar_lea.hbm %s1447_s4, %s747_s26 }
 0x188   : > { %s553_s8 = sshll.u32 %s307_s14, 4  ;;  %v912_v48 = vpop.eup %911  ;;  %s532_s30 = scalar_lea.sflag [#allocation4], %s1285_s17  ;;  %s1396_s8 = int_to_ptr.vmem [resolvable:$true] %s553_s8 }
 0x189   : > { %v914_v49 = vpop.eup %913  ;;  %v525_v50 = vmul.f32 %v912_v48, %v908_v46  ;;  %s1001_s27 = scalar_lea.vmem %s1396_s8, 256  ;;  %s1102_s10 = smov [#allocation7]  }
 0x18a   : > { %v526_v51 = vmul.f32 %v914_v49, %v910_v47  ;;  %p1002_p11 = scmp.ne.s32.totalorder %s1396_s8, %s1001_s27  ;;  %s1005_s21 = sshll.u32 %s1102_s10, 4  ;;  %s1006_s21 = int_to_ptr.vmem [resolvable:$false] %s1005_s21 }
 0x18b   : > { %529 = vst [vmem:[%s307_s14] sm:$0xff] %v525_v50  ;;  %s1007_s11 = scalar_lea.vmem %s1006_s21, 512  ;;  %p1008_p9 = scmp.lt.s32.totalorder %s1396_s8, %s1006_s21 }
 0x18c   : > { %530 = vst [vmem:[%s307_s14 + $0x8] sm:$0xff] %v526_v51  ;;  %p1003_p0 = pnand %p1002_p11, %p1229_p10  ;;  %p1009_p1 = scmp.lt.s32.totalorder %s1007_s11, %s1001_s27 }
 0x18e   : > { %p1004_p5 = pneg %p1003_p0  ;;  %p1010_p2 = por %p1009_p1, %p1008_p9 }
 0x190   : > { %p1011_p3 = pnand %p1010_p2, %p1004_p5 }
 0x192   : > { %1014 = shalt.err (!%p1011_p3)
}
 0x193   : > { %s1015_s17 = scalar_lea.hbm %s1394_s7, 256  ;;  %s1019_s25 = scalar_lea.hbm %s1447_s4, 512 }
 0x194   : > { %p1016_p7 = scmp.ne.s32.totalorder %s1394_s7, %s1015_s17  ;;  %p1020_p6 = scmp.lt.u32.totalorder %s1394_s7, %s1447_s4 }
 0x195   : > { %p1021_p8 = scmp.lt.u32.totalorder %s1019_s25, %s1015_s17  ;;  %p1023_p11 = scmp.lt.u32.totalorder %s1015_s17, %s1394_s7 }
 0x196   : > { %p1017_p13 = pnand %p1016_p7, %p1229_p10 }
 0x197   : > { %p1022_p12 = por %p1021_p8, %p1020_p6 }
 0x198   : > { %p1018_p4 = pneg %p1017_p13 }
 0x199   : > { %p1024_p0 = por %p1023_p11, %p1022_p12 }
 0x19b   : > { %p1025_p5 = pnand %p1024_p0, %p1018_p4 }
 0x19d   : > { %1028 = shalt.err (!%p1025_p5)
}
 0x19e   : > { %803 = dma.vmem_to_hbm [thread:$0]  (%p1229_p10), %s1396_s8, 256, %s1394_s7, %s532_s30  }
 0x19f PF: > { %s581_s14 = sand.u32 1, %s1071_s18   ;;  %p1466_p9 = scmp.ne.s32.totalorder %s1456_s29, 0 }
 0x1a0   : > { %p1467_p1 = scmp.ge.s32.totalorder %s1091_s23, 2  ;;  %s582_s12 = scalar_lea.sflag [#allocation4], %s581_s14 }
 0x1a2   : > { %p816_p2 = pnand %p1467_p1, %p1466_p9 }
 0x1a4   : > { %1062 = dma.done.wait (!%p816_p2), %s582_s12, 256  }
 0x1a5   : > { %1064 = vsyncadd (!%p816_p2), %s582_s12, 4294967040  ;;  %s591_s24 = scalar_lea.sflag [#allocation9], %s581_s14 }
 0x1a6   : > { %1066 = dma.done.wait (!%p816_p2), %s591_s24, 256  }
 0x1a7   : > { %1068 = vsyncadd (!%p816_p2), %s591_s24, 4294967040  ;;  %s26_s23 = sadd.s32 1, %s1091_s23   ;;  %s1468_s18 = smov %s1075_s19 }
 0x1a8   : > { %p23_p3 = scmp.ge.s32.totalorder %s26_s23, 4   ;;  %s1469_s19 = smov %s1079_s20 }
 0x1a9   : > { %s1470_s20 = smov %s1238_s15  ;;  %s1471_s21 = smov %s1087_s22 }
 0x1aa   : > { %s1472_s22 = smov %s1474_s9  ;;  %25 = sbr.rel (!%p23_p3) target bundleno = 9 (0x9), region = 105 }
 0x1b1   :  { %596 = vsyncpa [#allocation3], 1 }
 0x1b2   :  { %598 = vsyncpa [#allocation3 + $0x1], 1 }
 0x1b3   :  { %599 = vsyncpa [#allocation6], 1 }
 0x1b4   :  { %600 = vsyncpa [#allocation4], 1 }
 0x1b5   :  { %602 = vsyncpa [#allocation4 + $0x1], 1 }
 0x1b6   :  { %603 = vsyncpa [#allocation9], 1 }
 0x1b7   :  { %605 = vsyncpa [#allocation9 + $0x1], 1 }

</bundles_post_ra>
